<compile_context>
chip_gen: v5e
topology: v5e:2x2
jax: 0.10.0
libtpu: 0.0.40
codegen_flags: <defaults>
</compile_context>

<pallas_src>
import math

import jax
import jax.numpy as jnp
from jax import lax
from jax.experimental import pallas as pl
from jax.experimental.pallas import tpu as pltpu

# ---------------- config (small shapes consistent with the module) ----------
B = 2
S = 8
D_MODEL = 32
HIDDEN = 64
NUM_EXPERTS = 8
NUM_ACTIVE = 2            # routing math below is specialized for top-2
BETA = 0.95
V_TH = 1.0                # snn.Leaky default threshold

TOKENS = B * S
TOK_BLK = TOKENS          # single grid step; re-tile to 128-256 for large T
EH = NUM_EXPERTS * HIDDEN

_E1 = math.exp(1.0)
SIG1 = _E1 / (1.0 + _E1)  # softmax([1, 0])[0]
SIG0 = 1.0 / (1.0 + _E1)  # softmax([1, 0])[1]


# ---------------- fused Pallas kernel ----------------------------------------
def _spiking_moe_kernel(x_ref, wfused_ref, wd_ref, tri_ref, expand_ref,
                        thr_ref, o_ref):
    # x_ref     : (TB, D)            bf16
    # wfused_ref: (D, 2*E*H + E)     bf16   == [w_gate | w_up | gate_w]
    # wd_ref    : (E*H, D)           bf16
    # tri_ref   : (E, E)             bf16   upper-triangular ones (j <= k)
    # expand_ref: (E, E*H)           bf16   expert -> hidden-slot expansion
    # thr_ref   : (1, E)             f32    per-expert threshold = V_TH - bias
    x = x_ref[...]                                        # bf16 MXU operand
    tb = x.shape[0]
    e = tri_ref.shape[0]
    eh = expand_ref.shape[1]

    # ---- one fused x-side matmul for gate/up/router ----
    xw = jnp.dot(x, wfused_ref[...], preferred_element_type=jnp.float32)
    g = xw[:, :eh]                                        # (tb, E*H)
    u = xw[:, eh:2 * eh]                                  # (tb, E*H)
    logits = xw[:, 2 * eh:]                               # (tb, E)

    # ---- gate: single-step LIF spike (fresh membrane, bias folded in thr) ----
    spikes = (logits > thr_ref[...]).astype(jnp.bfloat16)          # {0,1}

    # ---- top-2 routing weights (closed form over binary spikes) ----
    cum1 = jnp.dot(spikes, tri_ref[...],
                   preferred_element_type=jnp.float32)             # cum #spikes
    pos = (lax.broadcasted_iota(jnp.int32, (tb, e), 1) + 1).astype(jnp.float32)
    cum0 = pos - cum1                                              # cum #silent
    spikes_f = spikes.astype(jnp.float32)
    zeros_m = 1.0 - spikes_f
    fs1 = spikes_f * (cum1 == 1.0).astype(jnp.float32)             # 1st spiking
    fs2 = spikes_f * (cum1 == 2.0).astype(jnp.float32)             # 2nd spiking
    fz1 = zeros_m * (cum0 == 1.0).astype(jnp.float32)              # 1st silent
    fz2 = zeros_m * (cum0 == 2.0).astype(jnp.float32)              # 2nd silent
    n_spk = cum1[:, e - 1:e]                                       # (tb, 1)
    w_ge2 = 0.5 * (fs1 + fs2)                                      # softmax([1,1])
    w_eq1 = SIG1 * fs1 + SIG0 * fz1                                # softmax([1,0])
    w_eq0 = 0.5 * (fz1 + fz2)                                      # softmax([0,0])
    w = jnp.where(n_spk >= 2.0, w_ge2,
                  jnp.where(n_spk == 1.0, w_eq1, w_eq0))           # (tb, E)

    # ---- all experts as one wide block-diagonal SwiGLU ----
    hid = (g * jax.nn.sigmoid(g)) * u                              # silu(g)*u
    spk = (hid > V_TH).astype(jnp.float32)                         # expert LIF

    # Expand per-(token, expert) routing weight to the hidden slots (bf16 MXU,
    # exact for the 0/1 expand mask), fold into the binary spikes, one down-proj.
    w_full = jnp.dot(w.astype(jnp.bfloat16), expand_ref[...],
                     preferred_element_type=jnp.float32)           # (tb, E*H)
    # bf16 routing weights match the bf16-dtype PyTorch reference (softmax in bf16)
    spk_w = (spk * w_full).astype(jnp.bfloat16)
    out = jnp.dot(spk_w, wd_ref[...], preferred_element_type=jnp.float32)
    o_ref[...] = out.astype(o_ref.dtype)


# ---------------- wrapper -----------------------------------------------------
def spiking_moe_ffn(x, params):
    """x: [B, S, D] bf16 -> [B, S, D] bf16."""
    b, s, d = x.shape
    t = b * s
    e, h = NUM_EXPERTS, HIDDEN
    eh = e * h
    x2 = x.reshape(t, d)
    out = pl.pallas_call(
        _spiking_moe_kernel,
        out_shape=jax.ShapeDtypeStruct((t, d), x.dtype),
        grid=(t // TOK_BLK,),               # == 1 at these shapes
        in_specs=[
            pl.BlockSpec((TOK_BLK, d), lambda i: (i, 0)),
            pl.BlockSpec((d, 2 * eh + e), lambda i: (0, 0)),
            pl.BlockSpec((eh, d), lambda i: (0, 0)),
            pl.BlockSpec((e, e), lambda i: (0, 0)),
            pl.BlockSpec((e, eh), lambda i: (0, 0)),
            pl.BlockSpec((1, e), lambda i: (0, 0)),
        ],
        out_specs=pl.BlockSpec((TOK_BLK, d), lambda i: (i, 0)),
        # Single step: no megacore split at this size (it would only duplicate
        # the replicated weight DMAs). Re-enable "parallel" once T is large.
        compiler_params=pltpu.CompilerParams(
            dimension_semantics=("arbitrary",)),
    )(x2, params["w_fused"], params["w_down"],
      params["tri"], params["expand"], params["thresh"])
    return out.reshape(b, s, d)


def init_params(key):
    ks = jax.random.split(key, 5)
    e, d, h = NUM_EXPERTS, D_MODEL, HIDDEN
    eh = e * h
    gate_w = jax.random.normal(ks[0], (d, e), jnp.float32) / math.sqrt(d)
    gate_b = jax.random.normal(ks[1], (1, e), jnp.float32) * 0.5
    # per-expert SwiGLU weights, pre-packed for the fused kernel:
    #   w_gate / w_up: (D, E*H)  == columns [e*H:(e+1)*H] are expert e's W
    #   w_down       : (E*H, D)  == rows    [e*H:(e+1)*H] are expert e's W
    wg = jax.random.normal(ks[2], (e, d, h), jnp.float32) / math.sqrt(d)
    wu = jax.random.normal(ks[3], (e, d, h), jnp.float32) / math.sqrt(h) * 0 + \
         jax.random.normal(ks[3], (e, d, h), jnp.float32) / math.sqrt(d)
    wd = jax.random.normal(ks[4], (e, h, d), jnp.float32) / math.sqrt(h)
    w_gate = wg.transpose(1, 0, 2).reshape(d, eh)
    w_up = wu.transpose(1, 0, 2).reshape(d, eh)
    # fused x-side weight: [w_gate | w_up | gate_w]  -> (D, 2*E*H + E)
    w_fused = jnp.concatenate([w_gate, w_up, gate_w], axis=1).astype(jnp.bfloat16)
    w_down = wd.reshape(eh, d).astype(jnp.bfloat16)
    # constant routing masks (exact in bf16: 0/1 entries, counts <= E)
    r = jnp.arange(e, dtype=jnp.int32)[:, None]
    c = jnp.arange(e, dtype=jnp.int32)[None, :]
    tri = (r <= c).astype(jnp.bfloat16)                       # (E, E)
    cc = jnp.arange(eh, dtype=jnp.int32)[None, :]
    expand = ((cc // h) == r).astype(jnp.bfloat16)             # (E, E*H)
    # fold the (bf16) gate bias + LIF threshold into a per-expert threshold
    thresh = (V_TH - gate_b.astype(jnp.bfloat16).astype(jnp.float32))
    return {
        "w_fused": w_fused,
        "w_down": w_down,
        "tri": tri,
        "expand": expand,
        "thresh": thresh.astype(jnp.float32),
    }


if __name__ == "__main__":
    root = jax.random.PRNGKey(0)
    k_x, k_p = jax.random.split(root)
    params = init_params(k_p)
    x = (jax.random.normal(k_x, (B, S, D_MODEL), jnp.float32) * 1.5
         ).astype(jnp.bfloat16)

    y = spiking_moe_ffn(x, params)
    y = jax.block_until_ready(y)
    assert y.shape == (B, S, D_MODEL) and y.dtype == jnp.bfloat16
    assert bool(jnp.all(jnp.isfinite(y.astype(jnp.float32))))
    print("KERNEL_OK")
</pallas_src>

<mosaic_0001>
module attributes {stable_mosaic.version = 11 : i64} {
  func.func @_spiking_moe_kernel(%arg0: i32, %arg1: memref<16x32xbf16, #tpu.memory_space<vmem>>, %arg2: memref<32x1032xbf16, #tpu.memory_space<vmem>>, %arg3: memref<512x32xbf16, #tpu.memory_space<vmem>>, %arg4: memref<8x8xbf16, #tpu.memory_space<vmem>>, %arg5: memref<8x512xbf16, #tpu.memory_space<vmem>>, %arg6: memref<1x8xf32, #tpu.memory_space<vmem>>, %arg7: memref<16x32xbf16, #tpu.memory_space<vmem>>) attributes {dimension_semantics = [#tpu.dimension_semantics<arbitrary>], iteration_bounds = array<i64: 1>, scalar_prefetch = 0 : i64, scratch_operands = 0 : i64, tpu.core_type = #tpu.core_type<tc>, window_params = [{transform_indices = @transform_0, window_bounds = array<i64: 16, 32>}, {pipeline_mode = #tpu.pipeline_mode<synchronous>, transform_indices = @transform_1, window_bounds = array<i64: 32, 1032>}, {pipeline_mode = #tpu.pipeline_mode<synchronous>, transform_indices = @transform_2, window_bounds = array<i64: 512, 32>}, {pipeline_mode = #tpu.pipeline_mode<synchronous>, transform_indices = @transform_3, window_bounds = array<i64: 8, 8>}, {pipeline_mode = #tpu.pipeline_mode<synchronous>, transform_indices = @transform_4, window_bounds = array<i64: 8, 512>}, {pipeline_mode = #tpu.pipeline_mode<synchronous>, transform_indices = @transform_5, window_bounds = array<i64: 1, 8>}, {transform_indices = @transform_6, window_bounds = array<i64: 16, 32>}]} {
    %c0 = arith.constant 0 : index
    %c0_0 = arith.constant 0 : index
    %0 = vector.load %arg1[%c0, %c0_0] : memref<16x32xbf16, #tpu.memory_space<vmem>>, vector<16x32xbf16>
    %c0_1 = arith.constant 0 : index
    %c0_2 = arith.constant 0 : index
    %1 = vector.load %arg2[%c0_1, %c0_2] : memref<32x1032xbf16, #tpu.memory_space<vmem>>, vector<32x1032xbf16>
    %cst = arith.constant dense<0.000000e+00> : vector<16x1032xf32>
    %2 = tpu.matmul %0, %1, %cst {dimension_numbers = #tpu.dot_dimension_numbers<[1], [0], [0], [1], [0, 0, 1, 1], [], []>} : vector<16x32xbf16>, vector<32x1032xbf16>, vector<16x1032xf32> -> vector<16x1032xf32>
    %3 = vector.extract_strided_slice %2 {offsets = [0, 0], sizes = [16, 512], strides = [1, 1]} : vector<16x1032xf32> to vector<16x512xf32>
    %4 = vector.extract_strided_slice %2 {offsets = [0, 512], sizes = [16, 512], strides = [1, 1]} : vector<16x1032xf32> to vector<16x512xf32>
    %5 = vector.extract_strided_slice %2 {offsets = [0, 1024], sizes = [16, 8], strides = [1, 1]} : vector<16x1032xf32> to vector<16x8xf32>
    %c0_3 = arith.constant 0 : index
    %c0_4 = arith.constant 0 : index
    %6 = vector.load %arg6[%c0_3, %c0_4] : memref<1x8xf32, #tpu.memory_space<vmem>>, vector<1x8xf32>
    %7 = vector.broadcast %6 : vector<1x8xf32> to vector<16x8xf32>
    %8 = arith.cmpf ogt, %5, %7 : vector<16x8xf32>
    %9 = arith.extui %8 : vector<16x8xi1> to vector<16x8xi32>
    %10 = arith.sitofp %9 : vector<16x8xi32> to vector<16x8xf32>
    %11 = arith.truncf %10 : vector<16x8xf32> to vector<16x8xbf16>
    %c0_5 = arith.constant 0 : index
    %c0_6 = arith.constant 0 : index
    %12 = vector.load %arg4[%c0_5, %c0_6] : memref<8x8xbf16, #tpu.memory_space<vmem>>, vector<8x8xbf16>
    %cst_7 = arith.constant dense<0.000000e+00> : vector<16x8xf32>
    %13 = tpu.matmul %11, %12, %cst_7 {dimension_numbers = #tpu.dot_dimension_numbers<[1], [0], [0], [1], [0, 0, 1, 1], [], []>} : vector<16x8xbf16>, vector<8x8xbf16>, vector<16x8xf32> -> vector<16x8xf32>
    %14 = tpu.iota {dimensions = array<i32: 1>} : vector<16x8xi32>
    %c1_i32 = arith.constant 1 : i32
    %15 = vector.broadcast %c1_i32 : i32 to vector<16x8xi32>
    %16 = arith.addi %14, %15 : vector<16x8xi32>
    %17 = arith.sitofp %16 : vector<16x8xi32> to vector<16x8xf32>
    %18 = arith.subf %17, %13 : vector<16x8xf32>
    %19 = arith.extf %11 : vector<16x8xbf16> to vector<16x8xf32>
    %cst_8 = arith.constant 1.000000e+00 : f32
    %20 = vector.broadcast %cst_8 : f32 to vector<16x8xf32>
    %21 = arith.subf %20, %19 : vector<16x8xf32>
    %cst_9 = arith.constant 1.000000e+00 : f32
    %22 = vector.broadcast %cst_9 : f32 to vector<16x8xf32>
    %23 = arith.cmpf oeq, %13, %22 : vector<16x8xf32>
    %24 = arith.extui %23 : vector<16x8xi1> to vector<16x8xi32>
    %25 = arith.sitofp %24 : vector<16x8xi32> to vector<16x8xf32>
    %26 = arith.mulf %19, %25 : vector<16x8xf32>
    %cst_10 = arith.constant 2.000000e+00 : f32
    %27 = vector.broadcast %cst_10 : f32 to vector<16x8xf32>
    %28 = arith.cmpf oeq, %13, %27 : vector<16x8xf32>
    %29 = arith.extui %28 : vector<16x8xi1> to vector<16x8xi32>
    %30 = arith.sitofp %29 : vector<16x8xi32> to vector<16x8xf32>
    %31 = arith.mulf %19, %30 : vector<16x8xf32>
    %cst_11 = arith.constant 1.000000e+00 : f32
    %32 = vector.broadcast %cst_11 : f32 to vector<16x8xf32>
    %33 = arith.cmpf oeq, %18, %32 : vector<16x8xf32>
    %34 = arith.extui %33 : vector<16x8xi1> to vector<16x8xi32>
    %35 = arith.sitofp %34 : vector<16x8xi32> to vector<16x8xf32>
    %36 = arith.mulf %21, %35 : vector<16x8xf32>
    %cst_12 = arith.constant 2.000000e+00 : f32
    %37 = vector.broadcast %cst_12 : f32 to vector<16x8xf32>
    %38 = arith.cmpf oeq, %18, %37 : vector<16x8xf32>
    %39 = arith.extui %38 : vector<16x8xi1> to vector<16x8xi32>
    %40 = arith.sitofp %39 : vector<16x8xi32> to vector<16x8xf32>
    %41 = arith.mulf %21, %40 : vector<16x8xf32>
    %42 = vector.extract_strided_slice %13 {offsets = [0, 7], sizes = [16, 1], strides = [1, 1]} : vector<16x8xf32> to vector<16x1xf32>
    %43 = arith.addf %26, %31 : vector<16x8xf32>
    %cst_13 = arith.constant 5.000000e-01 : f32
    %44 = vector.broadcast %cst_13 : f32 to vector<16x8xf32>
    %45 = arith.mulf %44, %43 : vector<16x8xf32>
    %cst_14 = arith.constant 0.731058597 : f32
    %46 = vector.broadcast %cst_14 : f32 to vector<16x8xf32>
    %47 = arith.mulf %46, %26 : vector<16x8xf32>
    %cst_15 = arith.constant 0.268941432 : f32
    %48 = vector.broadcast %cst_15 : f32 to vector<16x8xf32>
    %49 = arith.mulf %48, %36 : vector<16x8xf32>
    %50 = arith.addf %47, %49 : vector<16x8xf32>
    %51 = arith.addf %36, %41 : vector<16x8xf32>
    %cst_16 = arith.constant 5.000000e-01 : f32
    %52 = vector.broadcast %cst_16 : f32 to vector<16x8xf32>
    %53 = arith.mulf %52, %51 : vector<16x8xf32>
    %cst_17 = arith.constant 2.000000e+00 : f32
    %54 = vector.broadcast %cst_17 : f32 to vector<16x1xf32>
    %55 = arith.cmpf oge, %42, %54 : vector<16x1xf32>
    %cst_18 = arith.constant 1.000000e+00 : f32
    %56 = vector.broadcast %cst_18 : f32 to vector<16x1xf32>
    %57 = arith.cmpf oeq, %42, %56 : vector<16x1xf32>
    %58 = vector.shape_cast %57 : vector<16x1xi1> to vector<16x1xi1>
    %59 = vector.broadcast %58 : vector<16x1xi1> to vector<16x8xi1>
    %60 = arith.select %59, %50, %53 : vector<16x8xi1>, vector<16x8xf32>
    %61 = vector.shape_cast %55 : vector<16x1xi1> to vector<16x1xi1>
    %62 = vector.broadcast %61 : vector<16x1xi1> to vector<16x8xi1>
    %63 = arith.select %62, %45, %60 : vector<16x8xi1>, vector<16x8xf32>
    %64 = arith.negf %3 : vector<16x512xf32>
    %65 = math.exp %64 : vector<16x512xf32>
    %cst_19 = arith.constant 1.000000e+00 : f32
    %66 = vector.broadcast %cst_19 : f32 to vector<16x512xf32>
    %67 = arith.addf %66, %65 : vector<16x512xf32>
    %68 = arith.divf %66, %67 : vector<16x512xf32>
    %69 = arith.mulf %3, %68 : vector<16x512xf32>
    %70 = arith.mulf %69, %4 : vector<16x512xf32>
    %cst_20 = arith.constant 1.000000e+00 : f32
    %71 = vector.broadcast %cst_20 : f32 to vector<16x512xf32>
    %72 = arith.cmpf ogt, %70, %71 : vector<16x512xf32>
    %73 = arith.extui %72 : vector<16x512xi1> to vector<16x512xi32>
    %74 = arith.sitofp %73 : vector<16x512xi32> to vector<16x512xf32>
    %75 = arith.truncf %63 : vector<16x8xf32> to vector<16x8xbf16>
    %c0_21 = arith.constant 0 : index
    %c0_22 = arith.constant 0 : index
    %76 = vector.load %arg5[%c0_21, %c0_22] : memref<8x512xbf16, #tpu.memory_space<vmem>>, vector<8x512xbf16>
    %cst_23 = arith.constant dense<0.000000e+00> : vector<16x512xf32>
    %77 = tpu.matmul %75, %76, %cst_23 {dimension_numbers = #tpu.dot_dimension_numbers<[1], [0], [0], [1], [0, 0, 1, 1], [], []>} : vector<16x8xbf16>, vector<8x512xbf16>, vector<16x512xf32> -> vector<16x512xf32>
    %78 = arith.mulf %74, %77 : vector<16x512xf32>
    %79 = arith.truncf %78 : vector<16x512xf32> to vector<16x512xbf16>
    %c0_24 = arith.constant 0 : index
    %c0_25 = arith.constant 0 : index
    %80 = vector.load %arg3[%c0_24, %c0_25] : memref<512x32xbf16, #tpu.memory_space<vmem>>, vector<512x32xbf16>
    %cst_26 = arith.constant dense<0.000000e+00> : vector<16x32xf32>
    %81 = tpu.matmul %79, %80, %cst_26 {dimension_numbers = #tpu.dot_dimension_numbers<[1], [0], [0], [1], [0, 0, 1, 1], [], []>} : vector<16x512xbf16>, vector<512x32xbf16>, vector<16x32xf32> -> vector<16x32xf32>
    %82 = arith.truncf %81 : vector<16x32xf32> to vector<16x32xbf16>
    %c0_27 = arith.constant 0 : index
    %c0_28 = arith.constant 0 : index
    %83 = vector.load %arg7[%c0_27, %c0_28] : memref<16x32xbf16, #tpu.memory_space<vmem>>, vector<16x32xbf16>
    tpu.vector_store %arg7[%c0_27, %c0_28], %82 {strides = array<i32>} : memref<16x32xbf16, #tpu.memory_space<vmem>>, vector<16x32xbf16>,
    return
  }
  func.func @transform_0(%arg0: i32) -> (i32, i32) {
    %c0_i32 = arith.constant 0 : i32
    %c0_i32_0 = arith.constant 0 : i32
    return %arg0, %c0_i32 : i32, i32
  }
  func.func @transform_1(%arg0: i32) -> (i32, i32) {
    %c0_i32 = arith.constant 0 : i32
    %c0_i32_0 = arith.constant 0 : i32
    %c0_i32_1 = arith.constant 0 : i32
    return %c0_i32, %c0_i32_0 : i32, i32
  }
  func.func @transform_2(%arg0: i32) -> (i32, i32) {
    %c0_i32 = arith.constant 0 : i32
    %c0_i32_0 = arith.constant 0 : i32
    %c0_i32_1 = arith.constant 0 : i32
    return %c0_i32, %c0_i32_0 : i32, i32
  }
  func.func @transform_3(%arg0: i32) -> (i32, i32) {
    %c0_i32 = arith.constant 0 : i32
    %c0_i32_0 = arith.constant 0 : i32
    %c0_i32_1 = arith.constant 0 : i32
    return %c0_i32, %c0_i32_0 : i32, i32
  }
  func.func @transform_4(%arg0: i32) -> (i32, i32) {
    %c0_i32 = arith.constant 0 : i32
    %c0_i32_0 = arith.constant 0 : i32
    %c0_i32_1 = arith.constant 0 : i32
    return %c0_i32, %c0_i32_0 : i32, i32
  }
  func.func @transform_5(%arg0: i32) -> (i32, i32) {
    %c0_i32 = arith.constant 0 : i32
    %c0_i32_0 = arith.constant 0 : i32
    %c0_i32_1 = arith.constant 0 : i32
    return %c0_i32, %c0_i32_0 : i32, i32
  }
  func.func @transform_6(%arg0: i32) -> (i32, i32) {
    %c0_i32 = arith.constant 0 : i32
    %c0_i32_0 = arith.constant 0 : i32
    return %arg0, %c0_i32 : i32, i32
  }
}

</mosaic_0001>

<bundles_post_ra>
// kernel: tpu_custom_call.1
= control target key start
LH: loop header
LB: loop body
LE: loop exit
PB: predicated region body
PF: predicated region fallthrough
CT: control target
= control target key end

     0   :  { %s1860_s0 = inlined_call_operand.vmem [shape: bf16[16,32], index: 0, kind: input, shape index: {}]   ;;  %s1861_s1 = inlined_call_operand.vmem [shape: bf16[32,1032], index: 1, kind: input, shape index: {}]   ;;  %s1862_s2 = inlined_call_operand.vmem [shape: bf16[512,32], index: 2, kind: input, shape index: {}]   ;;  %s1863_s3 = inlined_call_operand.vmem [shape: bf16[8,8], index: 3, kind: input, shape index: {}]   ;;  %s1864_s4 = inlined_call_operand.vmem [shape: bf16[8,512], index: 4, kind: input, shape index: {}]   ;;  %s1865_s5 = inlined_call_operand.vmem [shape: f32[1,8], index: 5, kind: input, shape index: {}]   ;;  %s1866_s6 = inlined_call_operand.hbm [shape: bf16[16,32], index: 6, kind: output, shape index: {}]  }
   0x1   :  { %v1059_v0 = vld [vmem:[%s1861_s1 + $0x48] sm:$0xf]  ;;  %v1275_v1 = vld [vmem:[%s1861_s1 + $0x68] sm:$0xf0]  ;;  %v1023_v2 = vld [vmem:[%s1861_s1] sm:$0xf] }
   0x2   :  { %v1060_v3 = vor.u32 %v1275_v1, %v1059_v0  ;;  %v1266_v4 = vld [vmem:[%s1861_s1 + $0x20] sm:$0xf0]  ;;  %v1075_v5 = vld [vmem:[%s1861_s1 + $0x58] sm:$0xf]  ;;  %v1277_v6 = vld [vmem:[%s1861_s1 + $0x78] sm:$0xf0] }
   0x3   :  { %v1024_v7 = vor.u32 %v1266_v4, %v1023_v2  ;;  %v1076_v8 = vor.u32 %v1277_v6, %v1075_v5 }
   0x4   :  { %154 = vmatpush.bf16.msra.mxu0 %v1060_v3 }
   0x5   :  { %11 = vsyncpa [#allocation3], 0  ;;  %v1039_v9 = vld [vmem:[%s1861_s1 + $0x10] sm:$0xf]  ;;  %v1268_v10 = vld [vmem:[%s1861_s1 + $0x30] sm:$0xf0] }
   0x6   :  { %v1447_v11 = vld [vmem:[%s1860_s0] sm:$0xff]  ;;  %v1091_v12 = vld [vmem:[%s1861_s1 + $0x68] sm:$0xf]  ;;  %v1279_v13 = vld [vmem:[%s1861_s1 + $0x88] sm:$0xf0]  ;;  %vm144_vm0 = vcmask 261120   ;;  %v1040_v14 = vor.u32 %v1268_v10, %v1039_v9 }
   0x7   :  { %v1092_v15 = vor.u32 %v1279_v13, %v1091_v12  ;;  %v1055_v16 = vld [vmem:[%s1861_s1 + $0x20] sm:$0xf]  ;;  %v1270_v17 = vld [vmem:[%s1861_s1 + $0x40] sm:$0xf0]  ;;  %v1271_v18 = vld [vmem:[%s1861_s1 + $0x4c] sm:$0xf] }
   0x8   :  { %155 = vmatpush.bf16.msra.mxu0 %v1024_v7  ;;  %v1061_v19 = vld [vmem:[%s1861_s1 + $0x6c] sm:$0xf0]  ;;  %v1262_v20 = vld [vmem:[%s1861_s1 + $0x4] sm:$0xf]  ;;  %v1025_v22 = vld [vmem:[%s1861_s1 + $0x24] sm:$0xf0]  ;;  %v1056_v23 = vor.u32 %v1270_v17, %v1055_v16 }
   0x9   :  { %v1064_v21 = vor.u32 %v1271_v18, %v1061_v19  ;;  %v1028_v24 = vor.u32 %v1262_v20, %v1025_v22  ;;  %v1273_v25 = vld [vmem:[%s1861_s1 + $0x5c] sm:$0xf]  ;;  %v1077_v26 = vld [vmem:[%s1861_s1 + $0x7c] sm:$0xf0]  ;;  %v1264_v28 = vld [vmem:[%s1861_s1 + $0x14] sm:$0xf] }
   0xa   :  { %v1080_v27 = vor.u32 %v1273_v25, %v1077_v26  ;;  %v1041_v29 = vld [vmem:[%s1861_s1 + $0x34] sm:$0xf0]  ;;  %v286_v36 = vld [vmem:[%s1863_s3] sm:$0xf]  ;;  %vm296_vm1 = vcmask 1043456   ;;  %v1379_v4 = vmov 0.0  }
   0xb   :  { %1093 = vmatmul.msk.bf16.vlgmr.msra.gmra.mxu0 %vm144_vm0, %v1447_v11  ;;  %168 = vmatpush.bf16.msra.mxu1 %v1064_v21  ;;  %v1044_v30 = vor.u32 %v1264_v28, %v1041_v29  ;;  %v298_v38 = vsel %vm296_vm1, %v286_v36, 0  ;;  %v1320_v61 = vld [vmem:[%s1865_s5] ss:$0 sm:$0xff]  ;;  %vm292_vm12 = vcmask 64512   ;;  %v1272_v36 = vld [vmem:[%s1861_s1 + $0x54] sm:$0xf] }
   0xc   :  { %210 = vmatpush.bf16.msrb.mxu0 %v1076_v8  ;;  %s1005_s7 = sshll.u32 %s1866_s6, 4  ;;  %s1383_s8 = smov 64   ;;  %s1006_s7 = int_to_ptr.hbm [resolvable:$true] %s1005_s7 }
   0xd   :  { %s1384_s9 = smov 4  }
   0xf   :  { %169 = vmatpush.bf16.msra.mxu1 %v1028_v24 }
  0x10   :  { %211 = vmatpush.bf16.msrb.mxu0 %v1040_v14 }
  0x12   :  { %1094 = vmatmul.msk.bf16.vlgmr.msra.gmra.mxu1 %vm144_vm0, %v1447_v11 }
  0x13   :  { %224 = vmatpush.bf16.msrb.mxu1 %v1080_v27 }
  0x14   :  { %266 = vmatpush.bf16.msra.mxu0 %v1092_v15 }
  0x17   :  { %225 = vmatpush.bf16.msrb.mxu1 %v1044_v30 }
  0x18   :  { %267 = vmatpush.bf16.msra.mxu0 %v1056_v23 }
  0x1b   :  { %1097 = vmatmul.msk.bf16.vlgmr.msrb.gmra.mxu0 %vm144_vm0, %v1447_v11  ;;  %307 = vmatpush.bf16.msra.mxu1 %v298_v38  ;;  %v1069_v38 = vld [vmem:[%s1861_s1 + $0x74] sm:$0xf0] }
  0x22   :  { %1098 = vmatmul.msk.bf16.vlgmr.msrb.gmra.mxu1 %vm144_vm0, %v1447_v11 }
  0x2b   :  { %1101 = vmatmul.msk.bf16.vlgmr.msra.gmra.mxu0 %vm144_vm0, %v1447_v11 }
  0x88   :  { %v157_v31 = vpop.f32.mrf.mxu0 }
  0x89   :  { %v1113_v32 = vmul.f32 -1.442695, %v157_v31 }
  0x8b   :  { %1321 = vpow2.f32 %v1113_v32 }
  0x8f   :  { %v171_v15 = vpop.f32.mrf.mxu1 }
  0x90   :  { %v159_v33 = vpop.f32.mrf.mxu0  ;;  %v1114_v16 = vmul.f32 -1.442695, %v171_v15 }
  0x91   :  { %v1322_v34 = vpop.eup %1321  ;;  %v1117_v35 = vmul.f32 -1.442695, %v159_v33 }
  0x92   :  { %v418_v37 = vadd.f32 1.0, %v1322_v34  ;;  %v1067_v34 = vld [vmem:[%s1861_s1 + $0x50] sm:$0xf] }
  0x93   :  { %1323 = vpow2.f32 %v1117_v35  ;;  %v1276_v35 = vld [vmem:[%s1861_s1 + $0x70] sm:$0xf0] }
  0x94   :  { %1325 = vrcp.f32 %v418_v37  ;;  %v437_v45 = vand.u32 2147483648, %v418_v37  ;;  %v435_v47 = vand.u32 2147483647, %v418_v37  ;;  %vm431_vm3 = vweird.f32 %v418_v37 }
  0x96   :  { %v438_v51 = vor.u32 1.1754944e-38, %v437_v45  ;;  %vm436_vm5 = vcmp.eq.f32.partialorder %v435_v47, 8.507059e+37  ;;  %v1083_v45 = vld [vmem:[%s1861_s1 + $0x60] sm:$0xf]  ;;  %v1278_v47 = vld [vmem:[%s1861_s1 + $0x80] sm:$0xf0] }
  0x97   :  { %v1517_v28 = vpop.f32.mrf.mxu1 }
  0x98   :  { %v213_v39 = vpop.f32.mrf.mxu0 }
  0x99   :  { %v1324_v40 = vpop.eup %1323 }
  0x9a   :  { %v1326_v41 = vpop.eup %1325  ;;  %v422_v42 = vadd.f32 1.0, %v1324_v40  ;;  %v1267_v40 = vld [vmem:[%s1861_s1 + $0x28] sm:$0xf0] }
  0x9b   :  { %v427_v43 = vmul.f32 %v1326_v41, %v418_v37  ;;  %vm432_vm2 = vweird.f32 %v1326_v41  ;;  %v1068_v37 = vor.u32 %v1276_v35, %v1067_v34 }
  0x9c   :  { %1327 = vrcp.f32 %v422_v42  ;;  %vm433_vm4 = vmor %vm431_vm3, %vm432_vm2  ;;  %v497_v57 = vand.u32 2147483648, %v422_v42  ;;  %v495_v59 = vand.u32 2147483647, %v422_v42  ;;  %vm491_vm7 = vweird.f32 %v422_v42 }
  0x9d   :  { %v428_v44 = vsub.f32 1.0, %v427_v43  ;;  %1329 = vpow2.f32 %v1114_v16  ;;  %v1263_v43 = vld [vmem:[%s1861_s1 + $0xc] sm:$0xf]  ;;  %182 = vmatpush.bf16.msra.mxu2 %v1068_v37 }
  0x9e   :  { %v498_v0 = vor.u32 1.1754944e-38, %v497_v57  ;;  %vm496_vm9 = vcmp.eq.f32.partialorder %v495_v59, 8.507059e+37  ;;  %v1265_v57 = vld [vmem:[%s1861_s1 + $0x1c] sm:$0xf] }
  0x9f   :  { %v429_v46 = vmul.f32 %v1326_v41, %v428_v44  ;;  %v1033_v44 = vld [vmem:[%s1861_s1 + $0x2c] sm:$0xf0] }
  0xa0   :  { %v215_v48 = vpop.f32.mrf.mxu0 }
  0xa1   :  { %v430_v49 = vadd.f32 %v1326_v41, %v429_v46 }
  0xa2   :  { %v1328_v50 = vpop.eup %1327 }
  0xa3   :  { %v434_v52 = vsel %vm433_vm4, %v1326_v41, %v430_v49  ;;  %v487_v53 = vmul.f32 %v1328_v50, %v422_v42  ;;  %vm492_vm6 = vweird.f32 %v1328_v50  ;;  %v1330_v17 = vpop.eup %1329  ;;  %v314_v41 = vlaneseq  ;;  %v1085_v49 = vld [vmem:[%s1861_s1 + $0x84] sm:$0xf0] }
  0xa4   :  { %v439_v54 = vsel %vm436_vm5, %v438_v51, %v434_v52  ;;  %vm493_vm8 = vmor %vm491_vm7, %vm492_vm6  ;;  %v419_v18 = vadd.f32 1.0, %v1330_v17  ;;  %v1072_v42 = vor.u32 %v1272_v36, %v1069_v38  ;;  %v1084_v51 = vor.u32 %v1278_v47, %v1083_v45 }
  0xa5   :  { %v546_v55 = vmul.f32 %v439_v54, %v157_v31  ;;  %v488_v56 = vsub.f32 1.0, %v487_v53  ;;  %v227_v31 = vpop.f32.mrf.mxu1  ;;  %v1047_v53 = vld [vmem:[%s1861_s1 + $0x18] sm:$0xf]  ;;  %v1269_v54 = vld [vmem:[%s1861_s1 + $0x38] sm:$0xf0] }
  0xa6   :  { %1331 = vrcp.f32 %v419_v18  ;;  %vm446_vm13 = vweird.f32 %v419_v18  ;;  %v452_v23 = vand.u32 2147483648, %v419_v18  ;;  %v450_v25 = vand.u32 2147483647, %v419_v18  ;;  %196 = vmatpush.bf16.msra.mxu3 %v1072_v42 }
  0xa7   :  { %v489_v58 = vmul.f32 %v1328_v50, %v488_v56  ;;  %v1499_v60 = vmul.f32 %v546_v55, %v213_v39  ;;  %v1031_v39 = vld [vmem:[%s1861_s1 + $0x8] sm:$0xf]  ;;  %v587_v55 = vld [vmem:[%s1864_s4] sm:$0xff]  ;;  %v315_v56 = vand.u32 127, %v314_v41 }
  0xa8   :  { %v269_v62 = vpop.f32.mrf.mxu0  ;;  %v453_v26 = vor.u32 1.1754944e-38, %v452_v23  ;;  %vm451_vm2 = vcmp.eq.f32.partialorder %v450_v25, 8.507059e+37  ;;  %v1032_v46 = vor.u32 %v1267_v40, %v1031_v39  ;;  %v591_v59 = vunpack.c.l.b16 %v587_v55 }
  0xa9   :  { %v490_v63 = vadd.f32 %v1328_v50, %v489_v58  ;;  %vm278_vm10 = vcmp.gt.f32.partialorder %v269_v62, %v1320_v61  ;;  %v1049_v58 = vld [vmem:[%s1861_s1 + $0x3c] sm:$0xf0]  ;;  %v1048_v62 = vor.u32 %v1269_v54, %v1047_v53 }
  0xaa   :  { %v1505_v5 = vsel %vm278_vm10, 1.0, %v1379_v4  ;;  %183 = vmatpush.bf16.msra.mxu2 %v1032_v46 }
  0xab   :  { %v494_v1 = vsel %vm493_vm8, %v1328_v50, %v490_v63  ;;  %v284_v8 = vpack.c.bf16 %v1505_v5, %v1505_v5  ;;  %v1036_v50 = vor.u32 %v1263_v43, %v1033_v44  ;;  %v595_v63 = vpack.c.b16 %v591_v59, %v591_v59 }
  0xac   :  { %v499_v2 = vsel %vm496_vm9, %v498_v0, %v494_v1  ;;  %v1332_v19 = vpop.eup %1331 }
  0xad   :  { %v550_v3 = vmul.f32 %v499_v2, %v159_v33  ;;  %v289_v12 = vunpack.c.l.b16 %v284_v8  ;;  %v442_v20 = vmul.f32 %v1332_v19, %v419_v18  ;;  %vm447_vm14 = vweird.f32 %v1332_v19  ;;  %197 = vmatpush.bf16.msra.mxu3 %v1036_v50  ;;  %v1572_v1 = vpop.f32.mrf.mxu1  ;;  %1095 = vmatmul.msk.bf16.vlgmr.msra.gmra.mxu2 %vm144_vm0, %v1447_v11 }
  0xae   :  { %vm448_vm15 = vmor %vm446_vm13, %vm447_vm14  ;;  %v1380_v33 = vmov 7   ;;  %238 = vmatpush.bf16.msrb.mxu2 %v1084_v51  ;;  %v1052_v2 = vor.u32 %v1265_v57, %v1049_v58 }
  0xaf   :  { %v1507_v6 = vmul.f32 %v550_v3, %v215_v48  ;;  %v443_v21 = vsub.f32 1.0, %v442_v20  ;;  %1319 = vset.pattern.permute.xlu1 %v1380_v33  ;;  %1318 = vset.pattern.permute.xlu0 %v1380_v33  ;;  %v1274_v48 = vld [vmem:[%s1861_s1 + $0x64] sm:$0xf]  ;;  %v316_v3 = vadd.s32 1, %v315_v56 }
  0xb0   :  { %v271_v7 = vpop.f32.mrf.mxu0  ;;  %v1088_v52 = vor.u32 %v1274_v48, %v1085_v49  ;;  %1096 = vmatmul.msk.bf16.vlgmr.msra.gmra.mxu3 %vm144_vm0, %v1447_v11 }
  0xb1   :  { %vm279_vm11 = vcmp.gt.f32.partialorder %v271_v7, %v1320_v61  ;;  %v444_v22 = vmul.f32 %v1332_v19, %v443_v21  ;;  %v592_v61 = vunpack.c.h.b16 %v587_v55  ;;  %v603_v7 = vsel %vm296_vm1, %v595_v63, 0 }
  0xb2   :  { %v1512_v9 = vsel %vm279_vm11, 1.0, %v1379_v4  ;;  %252 = vmatpush.bf16.msrb.mxu3 %v1088_v52  ;;  %239 = vmatpush.bf16.msrb.mxu2 %v1048_v62 }
  0xb3   :  { %v285_v10 = vpack.c.bf16 %v1512_v9, %v1512_v9  ;;  %v445_v24 = vadd.f32 %v1332_v19, %v444_v22  ;;  %v596_v0 = vpack.c.b16 %v592_v61, %v592_v61  ;;  %v323_v44 = vsub.f32 1.0, %v1512_v9 }
  0xb5   :  { %v290_v13 = vunpack.c.l.b16 %v285_v10  ;;  %v449_v27 = vsel %vm448_vm15, %v1332_v19, %v445_v24  ;;  %v606_v8 = vsel %vm296_vm1, %v596_v0, 0  ;;  %v317_v10 = vcvt.s32.f32 %v316_v3 }
  0xb6   :  { %v454_v29 = vsel %vm451_vm2, %v453_v26, %v449_v27  ;;  %253 = vmatpush.bf16.msrb.mxu3 %v1052_v2  ;;  %621 = vmatpush.bf16.msra.mxu2 %v603_v7  ;;  %v322_v19 = vsub.f32 1.0, %v1505_v5 }
  0xb7   :  { %v291_v14 = vpack.c.b16 %v290_v13, %v289_v12  ;;  %v547_v30 = vmul.f32 %v454_v29, %v171_v15  ;;  %v1381_v15 = vmov 0  }
  0xb9   :  { %1104 = vmatmul.msk.bf16.vlgmr.msra.gmra.mxu1 %vm292_vm12, %v291_v14  ;;  %v1519_v32 = vmul.f32 %v547_v30, %v227_v31  ;;  %v588_v31 = vld [vmem:[%s1864_s4 + $0x8] sm:$0xff] }
  0xba   :  { %635 = vmatpush.bf16.msra.mxu3 %v606_v8  ;;  %v593_v33 = vunpack.c.l.b16 %v588_v31  ;;  %v594_v34 = vunpack.c.h.b16 %v588_v31 }
  0xbc   :  { %v597_v35 = vpack.c.b16 %v593_v33, %v593_v33  ;;  %v598_v36 = vpack.c.b16 %v594_v34, %v594_v34 }
  0xbd   :  { %1099 = vmatmul.msk.bf16.vlgmr.msrb.gmra.mxu2 %vm144_vm0, %v1447_v11 }
  0xbe   :  { %v609_v37 = vsel %vm296_vm1, %v597_v35, 0  ;;  %v612_v38 = vsel %vm296_vm1, %v598_v36, 0  ;;  %v1118_v36 = vmul.f32 -1.442695, %v1517_v28 }
  0xbf   :  { %649 = vmatpush.bf16.msrb.mxu0 %v609_v37  ;;  %663 = vmatpush.bf16.msrb.mxu1 %v612_v38 }
  0xc0   :  { %1100 = vmatmul.msk.bf16.vlgmr.msrb.gmra.mxu3 %vm144_vm0, %v1447_v11 }
 0x136   :  { %v309_v12 = vpop.f32.mrf.mxu1 }
 0x137   :  { %v318_v13 = vsub.f32 %v317_v10, %v309_v12  ;;  %vm332_vm3 = vcmp.eq.f32.partialorder %v309_v12, 2.0  ;;  %vm370_vm4 = vcmp.ge.f32.partialorder %v309_v12, 2.0  ;;  %vm324_vm5 = vcmp.eq.f32.partialorder %v309_v12, 1.0  ;;  %v1311_v12 = vld [vmem:[%s1862_s2 + $0xf8] sm:$0xff] }
 0x138   :  { %v1107_v14 = vsel %vm332_vm3, 1.0, %v1379_v4  ;;  %v382_v16 = vsel %vm370_vm4, 1, %v1381_v15  ;;  %v326_v17 = vsel %vm324_vm5, 1, %v1381_v15  ;;  %v1105_v18 = vsel %vm324_vm5, 1.0, %v1379_v4  ;;  %980 = vmatpush.bf16.msra.mxu1 %v1311_v12 }
 0x139   :  { %vm340_vm6 = vcmp.eq.f32.partialorder %v318_v13, 1.0  ;;  %385 = vperm.xlu1 %1319, %v382_v16   ;;  %v330_v20 = vmul.f32 %v1105_v18, %v1505_v5  ;;  %v338_v21 = vmul.f32 %v1107_v14, %v1505_v5  ;;  %373 = vperm.xlu0 %1318, %v326_v17   ;;  %vm348_vm9 = vcmp.eq.f32.partialorder %v318_v13, 2.0  ;;  %v1287_v13 = vld [vmem:[%s1862_s2 + $0x38] sm:$0xff]  ;;  %v1310_v16 = vld [vmem:[%s1862_s2 + $0xf0] sm:$0xff] }
 0x13a   :  { %v1109_v22 = vsel %vm340_vm6, 1.0, %v1379_v4  ;;  %v1111_v11 = vsel %vm348_vm9, 1.0, %v1379_v4  ;;  %v1295_v14 = vld [vmem:[%s1862_s2 + $0x78] sm:$0xff]  ;;  %938 = vmatpush.bf16.msrb.mxu2 %v1287_v13  ;;  %v1286_v17 = vld [vmem:[%s1862_s2 + $0x30] sm:$0xff] }
 0x13b   :  { %v356_v23 = vadd.f32 %v338_v21, %v330_v20  ;;  %v346_v24 = vmul.f32 %v1109_v22, %v322_v19  ;;  %v360_v27 = vmul.f32 0.7310586, %v330_v20  ;;  %v354_v40 = vmul.f32 %v1111_v11, %v322_v19  ;;  %952 = vmatpush.bf16.msrb.mxu3 %v1295_v14  ;;  %v1294_v18 = vld [vmem:[%s1862_s2 + $0x70] sm:$0xff]  ;;  %v1301_v19 = vld [vmem:[%s1862_s2 + $0xa8] sm:$0xff] }
 0x13c   :  { %981 = vmatpush.bf16.msra.mxu1 %v1310_v16  ;;  %v1309_v20 = vld [vmem:[%s1862_s2 + $0xe8] sm:$0xff] }
 0x13d   :  { %v362_v26 = vmul.f32 0.26894143, %v346_v24  ;;  %v366_v41 = vadd.f32 %v354_v40, %v346_v24  ;;  %v358_v47 = vmul.f32 0.5, %v356_v23  ;;  %v1285_v21 = vld [vmem:[%s1862_s2 + $0x28] sm:$0xff]  ;;  %v1300_v23 = vld [vmem:[%s1862_s2 + $0xa0] sm:$0xff] }
 0x13e   :  { %v311_v25 = vpop.f32.mrf.mxu1  ;;  %939 = vmatpush.bf16.msrb.mxu2 %v1286_v17  ;;  %v1293_v22 = vld [vmem:[%s1862_s2 + $0x68] sm:$0xff]  ;;  %v1308_v24 = vld [vmem:[%s1862_s2 + $0xe0] sm:$0xff] }
 0x13f   :  { %vm371_vm7 = vcmp.ge.f32.partialorder %v311_v25, 2.0  ;;  %vm325_vm8 = vcmp.eq.f32.partialorder %v311_v25, 1.0  ;;  %v364_v5 = vadd.f32 %v362_v26, %v360_v27  ;;  %v319_v39 = vsub.f32 %v317_v10, %v311_v25  ;;  %953 = vmatpush.bf16.msrb.mxu3 %v1294_v18  ;;  %v1307_v26 = vld [vmem:[%s1862_s2 + $0xd8] sm:$0xff]  ;;  %v1657_v27 = vpop.f32.mrf.mxu2  ;;  %v1281_v14 = vld [vmem:[%s1862_s2 + $0x8] sm:$0xff] }
 0x140   :  { %v383_v29 = vsel %vm371_vm7, 1, %v1381_v15  ;;  %v327_v30 = vsel %vm325_vm8, 1, %v1381_v15  ;;  %vm333_vm11 = vcmp.eq.f32.partialorder %v311_v25, 2.0  ;;  %v1106_v46 = vsel %vm325_vm8, 1.0, %v1379_v4  ;;  %v1302_v15 = vld [vmem:[%s1862_s2 + $0xb0] sm:$0xff]  ;;  %982 = vmatpush.bf16.msra.mxu1 %v1309_v20  ;;  %v1299_v25 = vld [vmem:[%s1862_s2 + $0x98] sm:$0xff] }
 0x141   :  { %388 = vperm.xlu1 %1319, %v383_v29   ;;  %376 = vperm.xlu0 %1318, %v327_v30   ;;  %vm341_vm0 = vcmp.eq.f32.partialorder %v319_v39, 1.0  ;;  %vm349_vm10 = vcmp.eq.f32.partialorder %v319_v39, 2.0  ;;  %v1108_v45 = vsel %vm333_vm11, 1.0, %v1379_v4  ;;  %v368_v50 = vmul.f32 0.5, %v366_v41  ;;  %v1659_v29 = vpop.f32.mrf.mxu3 }
 0x142   :  { %v1110_v42 = vsel %vm341_vm0, 1.0, %v1379_v4  ;;  %v1112_v43 = vsel %vm349_vm10, 1.0, %v1379_v4  ;;  %v339_v53 = vmul.f32 %v1108_v45, %v1512_v9  ;;  %v331_v54 = vmul.f32 %v1106_v46, %v1512_v9  ;;  %v1303_v9 = vld [vmem:[%s1862_s2 + $0xb8] sm:$0xff]  ;;  %940 = vmatpush.bf16.msrb.mxu2 %v1285_v21  ;;  %v1284_v46 = vld [vmem:[%s1862_s2 + $0x20] sm:$0xff] }
 0x143   :  { %v347_v51 = vmul.f32 %v1110_v42, %v323_v44  ;;  %v355_v52 = vmul.f32 %v1112_v43, %v323_v44  ;;  %966 = vmatpush.bf16.msra.mxu0 %v1303_v9  ;;  %954 = vmatpush.bf16.msrb.mxu3 %v1293_v22  ;;  %v1116_v33 = vmul.f32 -1.442695, %v1659_v29 }
 0x144   :  { %v357_v59 = vadd.f32 %v339_v53, %v331_v54  ;;  %v361_v61 = vmul.f32 0.7310586, %v331_v54  ;;  %983 = vmatpush.bf16.msra.mxu1 %v1308_v24  ;;  %v1291_v53 = vld [vmem:[%s1862_s2 + $0x58] sm:$0xff]  ;;  %v1288_v24 = vld [vmem:[%s1862_s2 + $0x40] sm:$0xff] }
 0x145   :  { %v363_v57 = vmul.f32 0.26894143, %v347_v51  ;;  %v367_v58 = vadd.f32 %v355_v52, %v347_v51  ;;  %v1283_v52 = vld [vmem:[%s1862_s2 + $0x18] sm:$0xff] }
 0x146   :  { %v359_v3 = vmul.f32 0.5, %v357_v59  ;;  %941 = vmatpush.bf16.msrb.mxu2 %v1284_v46 }
 0x147   :  { %v365_v0 = vadd.f32 %v363_v57, %v361_v61  ;;  %v369_v2 = vmul.f32 0.5, %v367_v58  ;;  %967 = vmatpush.bf16.msra.mxu0 %v1302_v15  ;;  %v1661_v30 = vpop.f32.mrf.mxu2  ;;  %v1297_v57 = vld [vmem:[%s1862_s2 + $0x88] sm:$0xff] }
 0x148   :  { %984 = vmatpush.bf16.msra.mxu1 %v1307_v26  ;;  %v1119_v34 = vmul.f32 -1.442695, %v1661_v30  ;;  %v1305_v58 = vld [vmem:[%s1862_s2 + $0xc8] sm:$0xff] }
 0x149   :  { %v1664_v31 = vpop.f32.mrf.mxu3  ;;  %v1289_v15 = vld [vmem:[%s1862_s2 + $0x48] sm:$0xff] }
 0x14a   :  { %v1120_v35 = vmul.f32 -1.442695, %v1664_v31  ;;  %942 = vmatpush.bf16.msrb.mxu2 %v1283_v52 }
 0x14b   :  { %968 = vmatpush.bf16.msra.mxu0 %v1301_v19 }
 0x14f   :  { %969 = vmatpush.bf16.msra.mxu0 %v1300_v23  ;;  %v1280_v23 = vld [vmem:[%s1862_s2] sm:$0xff] }
 0x151   :  { %v255_v46 = vpop.f32.mrf.mxu3 }
 0x153   :  { %970 = vmatpush.bf16.msra.mxu0 %v1299_v25 }
 0x1ab   :  { %v386_v48 = vpop.permute.xlu1 %385  ;;  %v374_v49 = vpop.permute.xlu0 %373 }
 0x1ac   :  { %vm390_vm1 = vcmp.eq.s32.totalorder %v386_v48, 1  ;;  %vm378_vm13 = vcmp.eq.s32.totalorder %v374_v49, 1  ;;  %v1298_v49 = vld [vmem:[%s1862_s2 + $0x90] sm:$0xff] }
 0x1ad   :  { %v380_v55 = vsel %vm378_vm13, %v364_v5, %v368_v50  ;;  %v1115_v5 = vmul.f32 -1.442695, %v1657_v27  ;;  %v1306_v50 = vld [vmem:[%s1862_s2 + $0xd0] sm:$0xff]  ;;  %971 = vmatpush.bf16.msra.mxu0 %v1298_v49 }
 0x1ae   :  { %v392_v56 = vsel %vm390_vm1, %v358_v47, %v380_v55  ;;  %v1292_v47 = vld [vmem:[%s1862_s2 + $0x60] sm:$0xff]  ;;  %985 = vmatpush.bf16.msra.mxu1 %v1306_v50 }
 0x1af   :  { %1333 = vpow2.f32 %v1115_v5  ;;  %955 = vmatpush.bf16.msrb.mxu3 %v1292_v47 }
 0x1b0   :  { %1335 = vpow2.f32 %v1116_v33 }
 0x1b1   :  { %1337 = vpow2.f32 %v1119_v34  ;;  %972 = vmatpush.bf16.msra.mxu0 %v1297_v57 }
 0x1b2   :  { %1339 = vpow2.f32 %v1120_v35  ;;  %986 = vmatpush.bf16.msra.mxu1 %v1305_v58 }
 0x1b3   :  { %v389_v62 = vpop.permute.xlu1 %388  ;;  %v377_v63 = vpop.permute.xlu0 %376  ;;  %1341 = vpow2.f32 %v1118_v36  ;;  %956 = vmatpush.bf16.msrb.mxu3 %v1291_v53 }
 0x1b4   :  { %vm391_vm14 = vcmp.eq.s32.totalorder %v389_v62, 1  ;;  %vm379_vm15 = vcmp.eq.s32.totalorder %v377_v63, 1 }
 0x1b5   :  { %v381_v7 = vsel %vm379_vm15, %v365_v0, %v369_v2  ;;  %v1334_v37 = vpop.eup %1333  ;;  %v1282_v0 = vld [vmem:[%s1862_s2 + $0x10] sm:$0xff] }
 0x1b6   :  { %v393_v8 = vsel %vm391_vm14, %v359_v3, %v381_v7  ;;  %v1336_v38 = vpop.eup %1335  ;;  %v1670_v40 = vadd.f32 1.0, %v1334_v37  ;;  %v1290_v2 = vld [vmem:[%s1862_s2 + $0x50] sm:$0xff]  ;;  %943 = vmatpush.bf16.msrb.mxu2 %v1282_v0  ;;  %v1296_v7 = vld [vmem:[%s1862_s2 + $0x80] sm:$0xff] }
 0x1b7   :  { %v586_v10 = vpack.c.bf16 %v393_v8, %v392_v56  ;;  %v1338_v11 = vpop.eup %1337  ;;  %v1672_v41 = vadd.f32 1.0, %v1336_v38  ;;  %957 = vmatpush.bf16.msrb.mxu3 %v1290_v2  ;;  %v1304_v8 = vld [vmem:[%s1862_s2 + $0xc0] sm:$0xff]  ;;  %973 = vmatpush.bf16.msra.mxu0 %v1296_v7  ;;  %s1382_s2 = smov [#allocation2]  }
 0x1b8   :  { %v1340_v39 = vpop.eup %1339  ;;  %v1674_v43 = vadd.f32 1.0, %v1338_v11  ;;  %1343 = vrcp.f32 %v1670_v40  ;;  %987 = vmatpush.bf16.msra.mxu1 %v1304_v8  ;;  %v465_v21 = vand.u32 2147483647, %v1670_v40  ;;  %v467_v22 = vand.u32 2147483648, %v1670_v40  ;;  %s1003_s28 = sshll.u32 %s1382_s2, 4  ;;  %s1004_s28 = int_to_ptr.vmem [resolvable:$true] %s1003_s28 }
 0x1b9   :  { %1129 = vmatmul.msk.bf16.vlgmr.msra.gmra.mxu2 %vm292_vm12, %v586_v10  ;;  %1130 = vmatmul.msk.bf16.vlgmr.msra.gmra.mxu3 %vm292_vm12, %v586_v10  ;;  %v1342_v42 = vpop.eup %1341  ;;  %v1676_v44 = vadd.f32 1.0, %v1340_v39  ;;  %1345 = vrcp.f32 %v1672_v41  ;;  %vm476_vm3 = vweird.f32 %v1672_v41  ;;  %v480_v26 = vand.u32 2147483647, %v1672_v41 }
 0x1ba   :  { %1131 = vmatmul.msk.bf16.vlgmr.msrb.gmra.mxu0 %vm292_vm12, %v586_v10  ;;  %1132 = vmatmul.msk.bf16.vlgmr.msrb.gmra.mxu1 %vm292_vm12, %v586_v10  ;;  %v1679_v45 = vadd.f32 1.0, %v1342_v42  ;;  %1347 = vrcp.f32 %v1674_v43  ;;  %vm461_vm12 = vweird.f32 %v1670_v40  ;;  %vm521_vm5 = vweird.f32 %v1674_v43  ;;  %v241_v42 = vpop.f32.mrf.mxu2 }
 0x1bb   :  { %1349 = vrcp.f32 %v1676_v44  ;;  %944 = vmatpush.bf16.msrb.mxu2 %v1281_v14  ;;  %958 = vmatpush.bf16.msrb.mxu3 %v1289_v15  ;;  %v482_v5 = vand.u32 2147483648, %v1672_v41  ;;  %vm536_vm8 = vweird.f32 %v1676_v44  ;;  %v525_v34 = vand.u32 2147483647, %v1674_v43 }
 0x1bc   :  { %1351 = vrcp.f32 %v1679_v45  ;;  %v527_v35 = vand.u32 2147483648, %v1674_v43  ;;  %v540_v36 = vand.u32 2147483647, %v1676_v44  ;;  %v542_v37 = vand.u32 2147483648, %v1676_v44 }
 0x1bd   :  { %vm506_vm11 = vweird.f32 %v1679_v45  ;;  %v512_v49 = vand.u32 2147483648, %v1679_v45  ;;  %vm1813_vm14 = vcmp.eq.f32.partialorder %v465_v21, 8.507059e+37  ;;  %v468_v52 = vor.u32 1.1754944e-38, %v467_v22 }
 0x1be   :  { %v1691_v48 = vpop.eup %1343  ;;  %vm481_vm15 = vcmp.eq.f32.partialorder %v480_v26, 8.507059e+37  ;;  %v483_v53 = vor.u32 1.1754944e-38, %v482_v5  ;;  %v528_v57 = vor.u32 1.1754944e-38, %v527_v35  ;;  %v543_v58 = vor.u32 1.1754944e-38, %v542_v37 }
 0x1bf   :  { %v1699_v51 = vpop.eup %1345  ;;  %v457_v59 = vmul.f32 %v1691_v48, %v1670_v40  ;;  %vm462_vm2 = vweird.f32 %v1691_v48  ;;  %945 = vmatpush.bf16.msrb.mxu2 %v1280_v23  ;;  %959 = vmatpush.bf16.msrb.mxu3 %v1288_v24  ;;  %v510_v0 = vand.u32 2147483647, %v1679_v45 }
 0x1c0   :  { %v1707_v54 = vpop.eup %1347  ;;  %v472_v61 = vmul.f32 %v1699_v51, %v1672_v41  ;;  %vm477_vm4 = vweird.f32 %v1699_v51  ;;  %vm1769_vm7 = vmor %vm461_vm12, %vm462_vm2  ;;  %vm526_vm12 = vcmp.eq.f32.partialorder %v525_v34, 8.507059e+37  ;;  %vm541_vm2 = vcmp.eq.f32.partialorder %v540_v36, 8.507059e+37 }
 0x1c1   :  { %v1709_v55 = vpop.eup %1349  ;;  %v517_v62 = vmul.f32 %v1707_v54, %v1674_v43  ;;  %v458_v10 = vsub.f32 1.0, %v457_v59  ;;  %vm522_vm6 = vweird.f32 %v1707_v54  ;;  %vm1781_vm0 = vmor %vm476_vm3, %vm477_vm4  ;;  %vm511_vm4 = vcmp.eq.f32.partialorder %v510_v0, 8.507059e+37 }
 0x1c2   :  { %v1711_v56 = vpop.eup %1351  ;;  %v532_v63 = vmul.f32 %v1709_v55, %v1676_v44  ;;  %v473_v9 = vsub.f32 1.0, %v472_v61  ;;  %vm537_vm9 = vweird.f32 %v1709_v55  ;;  %vm1796_vm10 = vmor %vm521_vm5, %vm522_vm6 }
 0x1c3   :  { %v502_v3 = vmul.f32 %v1711_v56, %v1679_v45  ;;  %v518_v12 = vsub.f32 1.0, %v517_v62  ;;  %v459_v17 = vmul.f32 %v1691_v48, %v458_v10  ;;  %vm507_vm1 = vweird.f32 %v1711_v56  ;;  %vm1809_vm13 = vmor %vm536_vm8, %vm537_vm9  ;;  %v243_v45 = vpop.f32.mrf.mxu2 }
 0x1c4   :  { %v533_v13 = vsub.f32 1.0, %v532_v63  ;;  %v474_v18 = vmul.f32 %v1699_v51, %v473_v9  ;;  %vm508_vm3 = vmor %vm506_vm11, %vm507_vm1  ;;  %vm562_vm9 = vcmp.gt.f32.partialorder %v1499_v60, 1.0  ;;  %vm996_vm1 = vcmask 257024  }
 0x1c5   :  { %v503_v16 = vsub.f32 1.0, %v502_v3  ;;  %v519_v19 = vmul.f32 %v1707_v54, %v518_v12  ;;  %v460_v38 = vadd.f32 %v1691_v48, %v459_v17  ;;  %v257_v12 = vpop.f32.mrf.mxu3  ;;  %v1121_v34 = vsel %vm562_vm9, 1.0, %v1379_v4 }
 0x1c6   :  { %v534_v20 = vmul.f32 %v1709_v55, %v533_v13  ;;  %v475_v11 = vadd.f32 %v1699_v51, %v474_v18 }
 0x1c7   :  { %v520_v39 = vadd.f32 %v1707_v54, %v519_v19  ;;  %v504_v47 = vmul.f32 %v1711_v56, %v503_v16  ;;  %v464_v59 = vsel %vm1769_vm7, %v1691_v48, %v460_v38 }
 0x1c8   :  { %v535_v41 = vadd.f32 %v1709_v55, %v534_v20  ;;  %v479_v44 = vsel %vm1781_vm0, %v1699_v51, %v475_v11  ;;  %v469_v48 = vsel %vm1813_vm14, %v468_v52, %v464_v59  ;;  %vm566_vm0 = vcmp.gt.f32.partialorder %v1507_v6, 1.0 }
 0x1c9   :  { %v524_v61 = vsel %vm1796_vm10, %v1707_v54, %v520_v39  ;;  %v505_v63 = vadd.f32 %v1711_v56, %v504_v47  ;;  %v484_v51 = vsel %vm481_vm15, %v483_v53, %v479_v44  ;;  %v513_v54 = vor.u32 1.1754944e-38, %v512_v49 }
 0x1ca   :  { %v539_v62 = vsel %vm1809_vm13, %v1709_v55, %v535_v41  ;;  %v529_v2 = vsel %vm526_vm12, %v528_v57, %v524_v61  ;;  %v548_v55 = vmul.f32 %v469_v48, %v1657_v27  ;;  %v549_v8 = vmul.f32 %v484_v51, %v1659_v29 }
 0x1cb   :  { %v544_v3 = vsel %vm541_vm2, %v543_v58, %v539_v62  ;;  %v509_v7 = vsel %vm508_vm3, %v1711_v56, %v505_v63  ;;  %v552_v10 = vmul.f32 %v529_v2, %v1661_v30  ;;  %vm563_vm10 = vcmp.gt.f32.partialorder %v1519_v32, 1.0 }
 0x1cc   :  { %v553_v9 = vmul.f32 %v544_v3, %v1664_v31  ;;  %v514_v13 = vsel %vm511_vm4, %v513_v54, %v509_v7  ;;  %v556_v16 = vmul.f32 %v548_v55, %v241_v42  ;;  %v557_v17 = vmul.f32 %v549_v8, %v255_v46 }
 0x1cd   :  { %v560_v18 = vmul.f32 %v552_v10, %v243_v45  ;;  %v551_v56 = vmul.f32 %v514_v13, %v1517_v28  ;;  %v1122_v35 = vsel %vm563_vm10, 1.0, %v1379_v4  ;;  %v1125_v36 = vsel %vm566_vm0, 1.0, %v1379_v4 }
 0x1ce   :  { %v561_v19 = vmul.f32 %v553_v9, %v257_v12  ;;  %vm564_vm5 = vcmp.gt.f32.partialorder %v556_v16, 1.0  ;;  %vm565_vm6 = vcmp.gt.f32.partialorder %v557_v17, 1.0 }
 0x1cf   :  { %vm568_vm7 = vcmp.gt.f32.partialorder %v560_v18, 1.0  ;;  %v559_v30 = vmul.f32 %v551_v56, %v1572_v1  ;;  %v1123_v31 = vsel %vm564_vm5, 1.0, %v1379_v4  ;;  %v1124_v20 = vsel %vm565_vm6, 1.0, %v1379_v4 }
 0x1d0   :  { %vm569_vm8 = vcmp.gt.f32.partialorder %v561_v19, 1.0  ;;  %v1127_v21 = vsel %vm568_vm7, 1.0, %v1379_v4 }
 0x1d1   :  { %v1128_v23 = vsel %vm569_vm8, 1.0, %v1379_v4  ;;  %vm567_vm11 = vcmp.gt.f32.partialorder %v559_v30, 1.0 }
 0x1d2   :  { %v1126_v38 = vsel %vm567_vm11, 1.0, %v1379_v4 }
 0x237   :  { %v651_v14 = vpop.f32.mrf.mxu0  ;;  %v665_v15 = vpop.f32.mrf.mxu1 }
 0x238   :  { %v672_v25 = vmul.f32 %v1123_v31, %v651_v14  ;;  %v673_v28 = vmul.f32 %v1124_v20, %v665_v15 }
 0x23c   :  { %v623_v27 = vpop.f32.mrf.mxu2  ;;  %v637_v29 = vpop.f32.mrf.mxu3 }
 0x23d   :  { %v670_v60 = vmul.f32 %v1121_v34, %v623_v27  ;;  %v671_v39 = vmul.f32 %v1122_v35, %v637_v29 }
 0x23f   :  { %v653_v22 = vpop.f32.mrf.mxu0  ;;  %v667_v24 = vpop.f32.mrf.mxu1 }
 0x240   :  { %v676_v26 = vmul.f32 %v1127_v21, %v653_v22  ;;  %v677_v5 = vmul.f32 %v1128_v23, %v667_v24 }
 0x242   :  { %v680_v1 = vpack.c.bf16 %v676_v26, %v672_v25  ;;  %v681_v33 = vpack.c.bf16 %v677_v5, %v673_v28 }
 0x244   :  { %974 = vmatmul.bf16.vlgmr.msra.gmra.mxu0 %v680_v1  ;;  %988 = vmatmul.bf16.vlgmr.msra.gmra.mxu1 %v681_v33  ;;  %v625_v37 = vpop.f32.mrf.mxu2  ;;  %v639_v11 = vpop.f32.mrf.mxu3 }
 0x245   :  { %v674_v6 = vmul.f32 %v1125_v36, %v625_v37  ;;  %v675_v40 = vmul.f32 %v1126_v38, %v639_v11 }
 0x247   :  { %v678_v32 = vpack.c.bf16 %v674_v6, %v670_v60  ;;  %v679_v41 = vpack.c.bf16 %v675_v40, %v671_v39 }
 0x249   :  { %946 = vmatmul.bf16.vlgmr.msrb.gmra.mxu2 %v678_v32  ;;  %960 = vmatmul.bf16.vlgmr.msrb.gmra.mxu3 %v679_v41 }
 0x2c1   :  { %v975_v42 = vpop.f32.mrf.mxu0  ;;  %v989_v43 = vpop.f32.mrf.mxu1 }
 0x2c9   :  { %v977_v59 = vpop.f32.mrf.mxu0  ;;  %v991_v61 = vpop.f32.mrf.mxu1 }
 0x2cc   :  { %v947_v46 = vpop.f32.mrf.mxu2  ;;  %v961_v47 = vpop.f32.mrf.mxu3 }
 0x2cd   :  { %v962_v49 = vadd.f32 %v961_v47, %v947_v46 }
 0x2cf   :  { %v976_v50 = vadd.f32 %v975_v42, %v962_v49 }
 0x2d1   :  { %v990_v52 = vadd.f32 %v989_v43, %v976_v50 }
 0x2d3   :  { %v994_v53 = vpack.c.bf16 %v990_v52, %v990_v52 }
 0x2d4   :  { %v949_v57 = vpop.f32.mrf.mxu2  ;;  %v963_v4 = vpop.f32.mrf.mxu3 }
 0x2d5   :  { %997 = vst.msk [vmem:[#allocation2] sm:$0xf] %vm996_vm1, %v994_v53  ;;  %v964_v58 = vadd.f32 %v963_v4, %v949_v57 }
 0x2d7   :  { %v978_v44 = vadd.f32 %v977_v59, %v964_v58 }
 0x2d9   :  { %v992_v62 = vadd.f32 %v991_v61, %v978_v44 }
 0x2db   :  { %v995_v63 = vpack.c.bf16 %v992_v62, %v992_v62 }
 0x2dd   :  { %998 = vst.msk [vmem:[#allocation2 + $0x4] sm:$0xf] %vm996_vm1, %v995_v63 }
 0x2de   :  { %1011 = dma.vmem_to_hbm [thread:$0]  %s1004_s28, 128, %s1006_s7, [#allocation3], %s1383_s8, %s1383_s8, %s1384_s9  }
 0x2df   :  { %1377 = dma.done.wait [#allocation3], 128  }
 0x2e0   :  { %1378 = vsyncadd [#allocation3], 4294967168 }
 0x2e1   :  { %1016 = vsyncpa [#allocation3], 1 }

</bundles_post_ra>
